<compile_context>
chip_gen: v5e
topology: v5e:2x2
jax: 0.10.0
libtpu: 0.0.40
codegen_flags: <defaults>
</compile_context>

<pallas_src>
import jax
import jax.numpy as jnp
from jax.experimental import pallas as pl
from jax.experimental.pallas import tpu as pltpu


def _round_up(v, m):
    return (v + m - 1) // m * m


def _sentinel_kernel(x_ref, w_ref, b_ref, o_ref):
    """out = x @ w + b for one row tile.

    x_ref : (tile_m, K)  VMEM   activation rows (src dtype)
    w_ref : (K, N)       VMEM   fused weight, resident across the grid
    b_ref : (1, N)       VMEM   fused bias (f32), resident across the grid
    o_ref : (tile_m, N)  VMEM
    """
    acc = jnp.dot(x_ref[...], w_ref[...], preferred_element_type=jnp.float32)
    o_ref[...] = (acc + b_ref[...]).astype(o_ref.dtype)


def sentinel_forward(src, wp, bp, wd, bd, *, tile_m=None, out_dtype=jnp.float32):
    """SentinelDataModule forward.

    src : (B, S, data_dim)
    wp  : (dmodel, 1)          positional_layer.weight  (torch layout)
    bp  : (dmodel,)            positional_layer.bias
    wd  : (dmodel, data_dim-1) embed_layer.weight       (torch layout)
    bd  : (dmodel,)            embed_layer.bias
    returns (B, S, dmodel) in out_dtype (default float32, matching torch)
    """
    B, S, D = src.shape
    dmodel = wp.shape[0]
    M = B * S

    # --- fuse the two linears: out = src @ W + b -----------------------------
    w = jnp.concatenate([wp.T, wd.T], axis=0).astype(src.dtype)   # (D, dmodel)
    b = (bp.astype(jnp.float32) + bd.astype(jnp.float32)).reshape(1, dmodel)
    x = src.reshape(M, D)                                         # no dtype copy

    # --- lane-dense output packing (guaranteed) --------------------------------
    # (M, n_pad) row-major is bit-identical to (M/g, g*n_pad).  A block-diagonal
    # weight keeps the kernel a plain matmul while making the output last dim a
    # multiple of 128 (unmasked vst instead of vst.msk).  If dmodel does not
    # divide 128 we zero-pad the weight/bias columns to the next power of two;
    # if M is not a multiple of g we zero-pad rows.  Output is sliced back.
    if dmodel < 128:
        n_pad = pl.next_power_of_2(dmodel)        # divides 128
        g = 128 // n_pad
    else:
        n_pad = _round_up(dmodel, 128)
        g = 1

    if n_pad != dmodel:                           # pad output columns with zeros
        w = jnp.pad(w, ((0, 0), (0, n_pad - dmodel)))
        b = jnp.pad(b, ((0, 0), (0, n_pad - dmodel)))

    M_pad = _round_up(M, g)
    if M_pad != M:                                # pad rows so packing is exact
        x = jnp.pad(x, ((0, M_pad - M), (0, 0)))

    if g > 1:
        w = jnp.kron(jnp.eye(g, dtype=w.dtype), w)   # (g*D, g*n_pad) block-diag
        b = jnp.tile(b, (1, g))                      # (1, g*n_pad)
        x = x.reshape(M_pad // g, g * D)             # pure row-major reinterpretation

    rows, K = x.shape
    N = w.shape[1]
    x_item = x.dtype.itemsize
    w_item = w.dtype.itemsize
    out_item = jnp.dtype(out_dtype).itemsize

    # --- row tile: lane-padding-aware VMEM budget ------------------------------
    if tile_m is None:
        vmem_budget = 12 << 20                    # fits v5e 16 MiB / v6e+v7x 32 MiB scoped default
        resident = (2 * _round_up(K, 8) * _round_up(N, 128) * w_item
                    + 2 * 8 * _round_up(N, 128) * 4)           # weight + bias buffers
        per_row = 2 * (_round_up(K, 128) * x_item + _round_up(N, 128) * out_item)
        tile_m = min(4096, max(8, (vmem_budget - resident) // per_row))
    tile_m = int(tile_m)
    if tile_m >= rows:
        tile_m = rows                             # one full-extent block (always legal)
    else:
        tile_m = max(8, tile_m - tile_m % 8)      # non-full blocks need sublane alignment

    grid = (pl.cdiv(rows, tile_m),)               # ragged last block masked by Pallas

    out = pl.pallas_call(
        _sentinel_kernel,
        out_shape=jax.ShapeDtypeStruct((rows, N), out_dtype),
        grid_spec=pltpu.PrefetchScalarGridSpec(
            num_scalar_prefetch=0,
            grid=grid,
            in_specs=[
                pl.BlockSpec((tile_m, K), lambda i: (i, 0)),  # activation rows
                pl.BlockSpec((K, N), lambda i: (0, 0)),       # fused weight (resident)
                pl.BlockSpec((1, N), lambda i: (0, 0)),       # fused bias   (resident)
            ],
            out_specs=pl.BlockSpec((tile_m, N), lambda i: (i, 0)),
        ),
        compiler_params=pltpu.CompilerParams(
            dimension_semantics=("parallel",)),
        cost_estimate=pl.CostEstimate(
            flops=2 * M * D * dmodel,             # logical flops (block-diag zeros excluded)
            transcendentals=0,
            bytes_accessed=(M * D * x_item + D * dmodel * w_item
                            + 2 * dmodel * 4 + M * dmodel * out_item)),
    )(x, w, b)

    # undo packing / padding (no-op slices when nothing was padded)
    out = out.reshape(M_pad, n_pad)[:M, :dmodel]
    return out.reshape(B, S, dmodel)


def init_params(key, data_dim, dmodel):
    """Deterministic init mimicking nn.Linear (uniform +-1/sqrt(fan_in))."""
    k1, k2, k3, k4 = jax.random.split(key, 4)
    bnd_p = 1.0                                   # 1/sqrt(1)
    wp = jax.random.uniform(k1, (dmodel, 1), jnp.float32, -bnd_p, bnd_p)
    bp = jax.random.uniform(k2, (dmodel,), jnp.float32, -bnd_p, bnd_p)
    bnd_d = 1.0 / jnp.sqrt(float(data_dim - 1))
    wd = jax.random.uniform(k3, (dmodel, data_dim - 1), jnp.float32, -bnd_d, bnd_d)
    bd = jax.random.uniform(k4, (dmodel,), jnp.float32, -bnd_d, bnd_d)
    return wp, bp, wd, bd


def _reference(src, wp, bp, wd, bd):
    pe = src[:, :, 0:1] @ wp.T + bp
    de = src[:, :, 1:] @ wd.T + bd
    return pe + de


if __name__ == "__main__":
    key = jax.random.PRNGKey(0)

    # Main case: dmodel=32 packs 4 rows per 128-lane output row, no padding.
    B, S, data_dim, dmodel = 2, 8, 9, 32
    k_src, k_par, key = jax.random.split(key, 3)
    src = jax.random.normal(k_src, (B, S, data_dim), jnp.float32)
    wp, bp, wd, bd = init_params(k_par, data_dim, dmodel)

    out = sentinel_forward(src, wp, bp, wd, bd)
    out = jax.block_until_ready(out)
    ref = _reference(src, wp, bp, wd, bd)
    assert out.shape == (B, S, dmodel)
    assert jnp.allclose(out, ref, atol=1e-5, rtol=1e-5)

    # Robustness case: dmodel=48 (not a divisor of 128) and M=21 (odd) exercise
    # the column/row zero-padding path that keeps the output lane-dense.
    B2, S2, data_dim2, dmodel2 = 3, 7, 9, 48
    k_src2, k_par2 = jax.random.split(key)
    src2 = jax.random.normal(k_src2, (B2, S2, data_dim2), jnp.float32)
    wp2, bp2, wd2, bd2 = init_params(k_par2, data_dim2, dmodel2)

    out2 = sentinel_forward(src2, wp2, bp2, wd2, bd2)
    out2 = jax.block_until_ready(out2)
    ref2 = _reference(src2, wp2, bp2, wd2, bd2)
    assert out2.shape == (B2, S2, dmodel2)
    assert jnp.allclose(out2, ref2, atol=1e-5, rtol=1e-5)

    print("KERNEL_OK")
</pallas_src>

<mosaic_0001>
module attributes {stable_mosaic.version = 11 : i64} {
  func.func @_sentinel_kernel(%arg0: i32, %arg1: memref<4x36xf32, #tpu.memory_space<vmem>>, %arg2: memref<36x128xf32, #tpu.memory_space<vmem>>, %arg3: memref<1x128xf32, #tpu.memory_space<vmem>>, %arg4: memref<4x128xf32, #tpu.memory_space<vmem>>) attributes {dimension_semantics = [#tpu.dimension_semantics<parallel>], iteration_bounds = array<i64: 1>, scalar_prefetch = 0 : i64, scratch_operands = 0 : i64, tpu.core_type = #tpu.core_type<tc>, window_params = [{transform_indices = @transform_0, window_bounds = array<i64: 4, 36>}, {pipeline_mode = #tpu.pipeline_mode<synchronous>, transform_indices = @transform_1, window_bounds = array<i64: 36, 128>}, {pipeline_mode = #tpu.pipeline_mode<synchronous>, transform_indices = @transform_2, window_bounds = array<i64: 1, 128>}, {transform_indices = @transform_3, window_bounds = array<i64: 4, 128>}]} {
    %c0 = arith.constant 0 : index
    %c0_0 = arith.constant 0 : index
    %0 = vector.load %arg1[%c0, %c0_0] : memref<4x36xf32, #tpu.memory_space<vmem>>, vector<4x36xf32>
    %c0_1 = arith.constant 0 : index
    %c0_2 = arith.constant 0 : index
    %1 = vector.load %arg2[%c0_1, %c0_2] : memref<36x128xf32, #tpu.memory_space<vmem>>, vector<36x128xf32>
    %cst = arith.constant dense<0.000000e+00> : vector<4x128xf32>
    %2 = tpu.matmul %0, %1, %cst {dimension_numbers = #tpu.dot_dimension_numbers<[1], [0], [0], [1], [0, 0, 1, 1], [], []>} : vector<4x36xf32>, vector<36x128xf32>, vector<4x128xf32> -> vector<4x128xf32>
    %c0_3 = arith.constant 0 : index
    %c0_4 = arith.constant 0 : index
    %3 = vector.load %arg3[%c0_3, %c0_4] : memref<1x128xf32, #tpu.memory_space<vmem>>, vector<1x128xf32>
    %4 = vector.broadcast %3 : vector<1x128xf32> to vector<4x128xf32>
    %5 = arith.addf %2, %4 : vector<4x128xf32>
    %c0_5 = arith.constant 0 : index
    %c0_6 = arith.constant 0 : index
    %6 = vector.load %arg4[%c0_5, %c0_6] : memref<4x128xf32, #tpu.memory_space<vmem>>, vector<4x128xf32>
    tpu.vector_store %arg4[%c0_5, %c0_6], %5 {strides = array<i32>} : memref<4x128xf32, #tpu.memory_space<vmem>>, vector<4x128xf32>,
    return
  }
  func.func @transform_0(%arg0: i32) -> (i32, i32) {
    %c0_i32 = arith.constant 0 : i32
    %c0_i32_0 = arith.constant 0 : i32
    return %arg0, %c0_i32 : i32, i32
  }
  func.func @transform_1(%arg0: i32) -> (i32, i32) {
    %c0_i32 = arith.constant 0 : i32
    %c0_i32_0 = arith.constant 0 : i32
    %c0_i32_1 = arith.constant 0 : i32
    return %c0_i32, %c0_i32_0 : i32, i32
  }
  func.func @transform_2(%arg0: i32) -> (i32, i32) {
    %c0_i32 = arith.constant 0 : i32
    %c0_i32_0 = arith.constant 0 : i32
    %c0_i32_1 = arith.constant 0 : i32
    return %c0_i32, %c0_i32_0 : i32, i32
  }
  func.func @transform_3(%arg0: i32) -> (i32, i32) {
    %c0_i32 = arith.constant 0 : i32
    %c0_i32_0 = arith.constant 0 : i32
    return %arg0, %c0_i32 : i32, i32
  }
}

</mosaic_0001>

<bundles_post_ra>
// kernel: tpu_custom_call.1
= control target key start
LH: loop header
LB: loop body
LE: loop exit
PB: predicated region body
PF: predicated region fallthrough
CT: control target
= control target key end

     0   :  { %8 = vsyncpa [#allocation3], 0  ;;  %s225_s0 = inlined_call_operand.hbm [shape: f32[4,36], index: 0, kind: input, shape index: {}]   ;;  %s226_s1 = inlined_call_operand.hbm [shape: f32[36,128], index: 1, kind: input, shape index: {}]   ;;  %s227_s2 = inlined_call_operand.vmem [shape: f32[1,128], index: 2, kind: input, shape index: {}]   ;;  %s228_s3 = inlined_call_operand.hbm [shape: f32[4,128], index: 3, kind: output, shape index: {}]  }
   0x1   :  { %9 = vsyncpa [#allocation6], 0 }
   0x2   :  { %10 = vsyncpa [#allocation4], 0  ;;  %s16_s14 = sshll.u32 %s225_s0, 4  ;;  %s188_s15 = smov [#allocation2]   ;;  %s17_s14 = int_to_ptr.hbm [resolvable:$true] %s16_s14 }
   0x3   :  { %s18_s16 = sshll.u32 %s188_s15, 4  ;;  %s26_s19 = sshll.u32 %s226_s1, 4  ;;  %s19_s16 = int_to_ptr.vmem [resolvable:$true] %s18_s16  ;;  %s27_s19 = int_to_ptr.hbm [resolvable:$true] %s26_s19 }
   0x4   :  { %21 = dma.hbm_to_vmem [thread:$0]  %s17_s14, 64, %s19_s16, [#allocation3]  }
   0x5   :  { %s189_s20 = smov [#allocation5]   ;;  %s190_s22 = smov 128  }
   0x6   :  { %s28_s21 = sshll.u32 %s189_s20, 4  ;;  %s191_s23 = smov 8   ;;  %s29_s21 = int_to_ptr.vmem [resolvable:$true] %s28_s21 }
   0x7   :  { %34 = dma.hbm_to_vmem [thread:$0]  %s27_s19, 640, %s29_s21, [#allocation6], %s190_s22, %s190_s22, %s191_s23  }
   0x8   :  { %182 = dma.done.wait [#allocation3], 64  }
   0x9   :  { %183 = vsyncadd [#allocation3], 4294967232 }
   0xa   :  { %184 = dma.done.wait [#allocation6], 640  }
   0xb   :  { %185 = vsyncadd [#allocation6], 4294966656  ;;  %vm59_vm0 = vcmask 1043456   ;;  %v50_v0 = vld [vmem:[#allocation5 + $0x20] sm:$0xf]  ;;  %v49_v1 = vld [vmem:[#allocation5 + $0x18] sm:$0xff] }
   0xc   :  { %102 = vmatpush.msk.msra.mxu0 %vm59_vm0, %v50_v0  ;;  %v48_v2 = vld [vmem:[#allocation5 + $0x10] sm:$0xff]  ;;  %v47_v3 = vld [vmem:[#allocation5 + $0x8] sm:$0xff]  ;;  %v46_v4 = vld [vmem:[#allocation5] sm:$0xff]  ;;  %vm55_vm1 = vcmask 293888   ;;  %s192_s24 = smov [#allocation7]   ;;  %s91_s28 = sshll.u32 %s228_s3, 4  ;;  %s92_s28 = int_to_ptr.hbm [resolvable:$true] %s91_s28 }
   0xd   :  { %v45_v5 = vld [vmem:[#allocation2] sm:$0xf]  ;;  %s89_s25 = sshll.u32 %s192_s24, 4  ;;  %s90_s25 = int_to_ptr.vmem [resolvable:$true] %s89_s25 }
   0xe   :  { %75 = vmatpush.msra.mxu0 %v49_v1  ;;  %v109_v6 = vld [vmem:[%s227_s2] ss:$0 sm:$0xff] }
  0x10   :  { %76 = vmatpush.msra.mxu0 %v48_v2 }
  0x12   :  { %77 = vmatpush.msra.mxu0 %v47_v3 }
  0x14   :  { %78 = vmatpush.msra.mxu0 %v46_v4 }
  0x15   :  { %103 = vmatmul.msk.f32.vlgmr.msra.gmra.mxu0 %vm55_vm1, %v45_v5 }
  0x92   :  { %v80_v7 = vpop.f32.mrf.mxu0 }
  0x93   :  { %v81_v8 = vadd.f32 %v109_v6, %v80_v7 }
  0x95   :  { %83 = vst [vmem:[#allocation7] sm:$0xf] %v81_v8 }
  0x96   :  { %94 = dma.vmem_to_hbm [thread:$0]  %s90_s25, 64, %s92_s28, [#allocation4]  }
  0x97   :  { %186 = dma.done.wait [#allocation4], 64  }
  0x98   :  { %187 = vsyncadd [#allocation4], 4294967232 }
  0x99   :  { %99 = vsyncpa [#allocation3], 1 }
  0x9a   :  { %100 = vsyncpa [#allocation6], 1 }
  0x9b   :  { %101 = vsyncpa [#allocation4], 1 }

</bundles_post_ra>
